<compile_context>
chip_gen: v7x
topology: tpu7x:2x2x1
jax: 0.10.0
libtpu: 0.0.40
codegen_flags: <defaults>
</compile_context>

<pallas_src>
import jax
import jax.numpy as jnp
from jax.experimental import pallas as pl
from jax.experimental.pallas import tpu as pltpu

FILTER_SIZE = 3   # path-integral cutoff L (filter weights w_0 .. w_L)
LANE = 128        # TPU lane width: hidden / output feature dims padded to this
SUB = 8           # f32 sublane width: node count / narrow input dims padded to this


def _round_up(x, m):
    return (x + m - 1) // m * m


def _pad_to(a, shape):
    return jnp.pad(a, [(0, t - s) for s, t in zip(a.shape, shape)])


def _vmem():
    return pl.BlockSpec(memory_space=pltpu.MemorySpace.VMEM)


def _smem():
    return pl.BlockSpec(memory_space=pltpu.MemorySpace.SMEM)


# ------------------------------------------------------------------ kernel ---
def _make_pannet_kernel(num_layers, output_dim):
    """Fused forward: all PANConv layers + Linear head + log_softmax."""

    def kernel(*refs):
        adj_ref, x_ref = refs[0], refs[1]
        conv_refs = [refs[2 + 3 * i: 5 + 3 * i] for i in range(num_layers)]
        lw_ref = refs[2 + 3 * num_layers]
        lb_ref = refs[3 + 3 * num_layers]
        out_ref = refs[4 + 3 * num_layers]

        # ---- A^k powers (k = 1..FILTER_SIZE): computed once, cached in bf16 and
        #      shared by every layer.  rowsum(A^k) is taken from the f32 MXU
        #      accumulations so the degree math stays exact; the bf16 copies are
        #      only ever MXU operands.
        a_f32 = adj_ref[...]
        a_bf = a_f32.astype(jnp.bfloat16)
        pows_bf = [a_bf]
        rowsums = [jnp.sum(a_f32, axis=-1, keepdims=True)]        # rowsum(A^1), f32
        for _ in range(FILTER_SIZE - 1):
            ak_f32 = jnp.dot(pows_bf[-1], a_bf,
                             preferred_element_type=jnp.float32)
            rowsums.append(jnp.sum(ak_f32, axis=-1, keepdims=True))
            pows_bf.append(ak_f32.astype(jnp.bfloat16))

        x = x_ref[...]                                            # f32 activations
        for li in range(num_layers):
            fw_ref, w_ref, b_ref = conv_refs[li]
            w0 = fw_ref[0]                                        # identity weight

            # Weighted MET matrix WITHOUT the identity term; w0*I is folded in
            # analytically below (no eye materialization).  Built & consumed in
            # bf16 — it is purely an MXU operand.
            msum_bf = fw_ref[1].astype(jnp.bfloat16) * pows_bf[0]
            for k in range(1, FILTER_SIZE):
                msum_bf = msum_bf + fw_ref[k + 1].astype(jnp.bfloat16) * pows_bf[k]

            # degrees of M = w0*I + msum from the precomputed layer-invariant
            # rowsums: O(N) VALU instead of a per-layer N^2 lane reduction.
            deg = w0 + fw_ref[1] * rowsums[0]
            for k in range(1, FILTER_SIZE):
                deg = deg + fw_ref[k + 1] * rowsums[k]
            inv = jnp.where(deg > 0.0,
                            jax.lax.rsqrt(jnp.maximum(deg, 1e-12)), 0.0)  # [N,1]

            # project-first: M_norm @ (X @ W + b), using (D diagonal, A symmetric)
            #   M_norm @ v == inv * (w0 * (inv*v) + msum @ (inv*v))
            h = jnp.dot(x.astype(jnp.bfloat16), w_ref[...],
                        preferred_element_type=jnp.float32) + b_ref[...]
            hs = inv * h                                          # f32
            agg = jnp.dot(msum_bf, hs.astype(jnp.bfloat16),
                          preferred_element_type=jnp.float32)
            x = jnp.maximum(inv * (w0 * hs + agg), 0.0)           # ReLU, f32

        # ---- head: Linear + log_softmax over the TRUE output columns only
        logits = jnp.dot(x.astype(jnp.bfloat16), lw_ref[...],
                         preferred_element_type=jnp.float32) + lb_ref[...]
        lane_id = jax.lax.broadcasted_iota(jnp.int32, logits.shape, 1)
        logits = jnp.where(lane_id < output_dim, logits, -1e30)   # mask lane pad
        m = jnp.max(logits, axis=-1, keepdims=True)
        z = logits - m
        lse = jnp.log(jnp.sum(jnp.exp(z), axis=-1, keepdims=True))
        out_ref[...] = z - lse

    return kernel


# ----------------------------------------------------------------- wrapper ---
def pannet_forward(x, adj, params):
    """x: [N, input_dim] f32, adj: [N, N] dense SYMMETRIC 0/1 f32,
       params: {'conv': [(filt_w, W, b), ...], 'lin': (W, b)}."""
    N, in_dim = x.shape
    Np = _round_up(N, SUB)
    in_pad = _round_up(in_dim, SUB)

    adj_p = _pad_to(adj, (Np, Np))
    x_p = _pad_to(x, (Np, in_pad))

    lin_W, lin_b = params["lin"]
    output_dim = lin_W.shape[1]
    num_layers = len(params["conv"])

    inputs = [adj_p, x_p]
    in_specs = [_vmem(), _vmem()]
    cur_pad = in_pad
    flops = 2 * (FILTER_SIZE - 1) * Np ** 3            # A^2 .. A^L (computed once)
    for filt_w, W, b in params["conv"]:
        fin, fout = W.shape
        fout_pad = _round_up(fout, LANE)
        W_p = _pad_to(W, (cur_pad, fout_pad)).astype(jnp.bfloat16)   # bf16 MXU operand
        b_p = _pad_to(b, (1, fout_pad))
        inputs += [filt_w, W_p, b_p]
        in_specs += [_smem(), _vmem(), _vmem()]
        flops += 2 * Np * cur_pad * fout_pad           # projection
        flops += 2 * Np * Np * fout_pad                # aggregation
        flops += (2 * FILTER_SIZE + 4) * Np * Np       # msum build + scalings
        cur_pad = fout_pad

    out_pad = _round_up(output_dim, LANE)
    lw_p = _pad_to(lin_W, (cur_pad, out_pad)).astype(jnp.bfloat16)
    lb_p = _pad_to(lin_b, (1, out_pad))
    inputs += [lw_p, lb_p]
    in_specs += [_vmem(), _vmem()]
    flops += 2 * Np * cur_pad * out_pad

    bytes_accessed = (sum(int(a.size) * a.dtype.itemsize for a in inputs)
                      + Np * out_pad * 4)
    cost = pl.CostEstimate(
        flops=int(flops),
        transcendentals=int(Np * out_pad + 2 * Np * num_layers),
        bytes_accessed=int(bytes_accessed),
    )

    # VMEM budget (v7x: 64 MiB physical / 32 MiB default scoped):
    # adj f32 + bf16 A^k cache + bf16 msum + one f32 N^2 matmul temp + act/weights.
    vmem_need = (4 * Np * Np
                 + 2 * Np * Np * FILTER_SIZE
                 + 2 * Np * Np
                 + 4 * Np * Np
                 + 16 * Np * max(cur_pad, out_pad)
                 + bytes_accessed)
    vmem_limit = min(64 << 20, max(32 << 20, 2 * int(vmem_need)))

    kernel = _make_pannet_kernel(num_layers, output_dim)
    out_p = pl.pallas_call(
        kernel,
        out_shape=jax.ShapeDtypeStruct((Np, out_pad), jnp.float32),  # lane-dense
        in_specs=in_specs,
        out_specs=_vmem(),
        cost_estimate=cost,
        compiler_params=pltpu.CompilerParams(vmem_limit_bytes=vmem_limit),
    )(*inputs)
    return out_p[:N, :output_dim]


# --------------------------------------------------------------- reference ---
def pannet_reference(x, adj, params):
    """Pure-JAX f32 reference with the same PANConv semantics."""
    N = x.shape[0]
    eye = jnp.eye(N, dtype=jnp.float32)
    for filt_w, W, b in params["conv"]:
        M = filt_w[0] * eye
        Ak = eye
        for k in range(1, FILTER_SIZE + 1):
            Ak = Ak @ adj
            M = M + filt_w[k] * Ak
        deg_r = jnp.sum(M, axis=1, keepdims=True)
        deg_c = jnp.sum(M, axis=0, keepdims=True)
        inv_r = jnp.where(deg_r > 0, jax.lax.rsqrt(jnp.maximum(deg_r, 1e-12)), 0.0)
        inv_c = jnp.where(deg_c > 0, jax.lax.rsqrt(jnp.maximum(deg_c, 1e-12)), 0.0)
        Mn = inv_r * M * inv_c
        x = jax.nn.relu(Mn @ (x @ W + b))
    W, b = params["lin"]
    return jax.nn.log_softmax(x @ W + b, axis=1)


# -------------------------------------------------------------------- init ---
def init_params(key, input_dim, hidden_dim, output_dim, num_layers):
    params = {"conv": [], "lin": None}
    dims = [input_dim] + [hidden_dim] * num_layers
    for i in range(num_layers):
        key, kw = jax.random.split(key)
        fan_in = dims[i]
        W = jax.random.normal(kw, (dims[i], dims[i + 1]), jnp.float32) / jnp.sqrt(fan_in)
        b = jnp.zeros((1, dims[i + 1]), jnp.float32)
        filt_w = jnp.full((FILTER_SIZE + 1,), 0.5, jnp.float32)   # PANConv default init
        params["conv"].append((filt_w, W, b))
    key, kw = jax.random.split(key)
    W = jax.random.normal(kw, (hidden_dim, output_dim), jnp.float32) / jnp.sqrt(hidden_dim)
    b = jnp.zeros((1, output_dim), jnp.float32)
    params["lin"] = (W, b)
    return params


# -------------------------------------------------------------------- main ---
if __name__ == "__main__":
    N, E = 16, 40
    input_dim, hidden_dim, output_dim, num_layers = 4, 32, 8, 2

    key = jax.random.PRNGKey(0)
    kx, ks, kd, kp = jax.random.split(key, 4)

    x = jax.random.normal(kx, (N, input_dim), jnp.float32)       # data.x
    src = jax.random.randint(ks, (E,), 0, N)                     # data.edge_index[0]
    dst = jax.random.randint(kd, (E,), 0, N)                     # data.edge_index[1]
    batch = jnp.zeros((N,), jnp.int32)                           # data.batch (unused in fwd)

    # glue: densify + symmetrize the graph (scatter is not the hot path)
    adj = jnp.zeros((N, N), jnp.float32).at[src, dst].set(1.0)
    adj = jnp.maximum(adj, adj.T)

    params = init_params(kp, input_dim, hidden_dim, output_dim, num_layers)

    fwd = jax.jit(pannet_forward)
    out = jax.block_until_ready(fwd(x, adj, params))

    assert out.shape == (N, output_dim)
    # log_softmax sanity: rows exponentiate-sum to ~1 (softmax math is f32)
    assert bool(jnp.all(jnp.abs(jnp.sum(jnp.exp(out), axis=1) - 1.0) < 1e-4))
    # match the pure-f32 reference; tolerance covers bf16 MXU operands
    # (f32 accumulation) across two conv layers + head.
    ref = pannet_reference(x, adj, params)
    assert bool(jnp.max(jnp.abs(out - ref)) < 5e-2)
    print("KERNEL_OK")
</pallas_src>

<mosaic_0001>
module attributes {stable_mosaic.version = 11 : i64} {
  func.func @kernel(%arg0: memref<16x16xf32, #tpu.memory_space<vmem>>, %arg1: memref<16x8xf32, #tpu.memory_space<vmem>>, %arg2: memref<4xf32, #tpu.memory_space<smem>>, %arg3: memref<8x128xbf16, #tpu.memory_space<vmem>>, %arg4: memref<1x128xf32, #tpu.memory_space<vmem>>, %arg5: memref<4xf32, #tpu.memory_space<smem>>, %arg6: memref<128x128xbf16, #tpu.memory_space<vmem>>, %arg7: memref<1x128xf32, #tpu.memory_space<vmem>>, %arg8: memref<128x128xbf16, #tpu.memory_space<vmem>>, %arg9: memref<1x128xf32, #tpu.memory_space<vmem>>, %arg10: memref<16x128xf32, #tpu.memory_space<vmem>>) attributes {dimension_semantics = [], scalar_prefetch = 0 : i64, scratch_operands = 0 : i64, tpu.core_type = #tpu.core_type<tc>} {
    %c0 = arith.constant 0 : index
    %c0_0 = arith.constant 0 : index
    %0 = vector.load %arg0[%c0, %c0_0] : memref<16x16xf32, #tpu.memory_space<vmem>>, vector<16x16xf32>
    %1 = arith.truncf %0 : vector<16x16xf32> to vector<16x16xbf16>
    %cst = arith.constant dense<0.000000e+00> : vector<16xf32>
    %2 = vector.multi_reduction <add>, %0, %cst [1] : vector<16x16xf32> to vector<16xf32>
    %3 = vector.shape_cast %2 : vector<16xf32> to vector<16x1xf32>
    %cst_1 = arith.constant dense<0.000000e+00> : vector<16x16xf32>
    %4 = tpu.matmul %1, %1, %cst_1 {dimension_numbers = #tpu.dot_dimension_numbers<[1], [0], [0], [1], [0, 0, 1, 1], [], []>} : vector<16x16xbf16>, vector<16x16xbf16>, vector<16x16xf32> -> vector<16x16xf32>
    %cst_2 = arith.constant dense<0.000000e+00> : vector<16xf32>
    %5 = vector.multi_reduction <add>, %4, %cst_2 [1] : vector<16x16xf32> to vector<16xf32>
    %6 = vector.shape_cast %5 : vector<16xf32> to vector<16x1xf32>
    %7 = arith.truncf %4 : vector<16x16xf32> to vector<16x16xbf16>
    %cst_3 = arith.constant dense<0.000000e+00> : vector<16x16xf32>
    %8 = tpu.matmul %7, %1, %cst_3 {dimension_numbers = #tpu.dot_dimension_numbers<[1], [0], [0], [1], [0, 0, 1, 1], [], []>} : vector<16x16xbf16>, vector<16x16xbf16>, vector<16x16xf32> -> vector<16x16xf32>
    %cst_4 = arith.constant dense<0.000000e+00> : vector<16xf32>
    %9 = vector.multi_reduction <add>, %8, %cst_4 [1] : vector<16x16xf32> to vector<16xf32>
    %10 = vector.shape_cast %9 : vector<16xf32> to vector<16x1xf32>
    %11 = arith.truncf %8 : vector<16x16xf32> to vector<16x16xbf16>
    %c0_5 = arith.constant 0 : index
    %c0_6 = arith.constant 0 : index
    %12 = vector.load %arg1[%c0_5, %c0_6] : memref<16x8xf32, #tpu.memory_space<vmem>>, vector<16x8xf32>
    %c0_7 = arith.constant 0 : index
    %13 = memref.load %arg2[%c0_7] : memref<4xf32, #tpu.memory_space<smem>>
    %c1 = arith.constant 1 : index
    %14 = memref.load %arg2[%c1] : memref<4xf32, #tpu.memory_space<smem>>
    %15 = arith.truncf %14 : f32 to bf16
    %16 = vector.broadcast %15 : bf16 to vector<16x16xbf16>
    %17 = arith.mulf %16, %1 : vector<16x16xbf16>
    %c2 = arith.constant 2 : index
    %18 = memref.load %arg2[%c2] : memref<4xf32, #tpu.memory_space<smem>>
    %19 = arith.truncf %18 : f32 to bf16
    %20 = vector.broadcast %19 : bf16 to vector<16x16xbf16>
    %21 = arith.mulf %20, %7 : vector<16x16xbf16>
    %22 = arith.addf %17, %21 : vector<16x16xbf16>
    %c3 = arith.constant 3 : index
    %23 = memref.load %arg2[%c3] : memref<4xf32, #tpu.memory_space<smem>>
    %24 = arith.truncf %23 : f32 to bf16
    %25 = vector.broadcast %24 : bf16 to vector<16x16xbf16>
    %26 = arith.mulf %25, %11 : vector<16x16xbf16>
    %27 = arith.addf %22, %26 : vector<16x16xbf16>
    %c1_8 = arith.constant 1 : index
    %28 = memref.load %arg2[%c1_8] : memref<4xf32, #tpu.memory_space<smem>>
    %29 = vector.broadcast %28 : f32 to vector<16x1xf32>
    %30 = arith.mulf %29, %3 : vector<16x1xf32>
    %31 = vector.broadcast %13 : f32 to vector<16x1xf32>
    %32 = arith.addf %31, %30 : vector<16x1xf32>
    %c2_9 = arith.constant 2 : index
    %33 = memref.load %arg2[%c2_9] : memref<4xf32, #tpu.memory_space<smem>>
    %34 = vector.broadcast %33 : f32 to vector<16x1xf32>
    %35 = arith.mulf %34, %6 : vector<16x1xf32>
    %36 = arith.addf %32, %35 : vector<16x1xf32>
    %c3_10 = arith.constant 3 : index
    %37 = memref.load %arg2[%c3_10] : memref<4xf32, #tpu.memory_space<smem>>
    %38 = vector.broadcast %37 : f32 to vector<16x1xf32>
    %39 = arith.mulf %38, %10 : vector<16x1xf32>
    %40 = arith.addf %36, %39 : vector<16x1xf32>
    %cst_11 = arith.constant 0.000000e+00 : f32
    %41 = vector.broadcast %cst_11 : f32 to vector<16x1xf32>
    %42 = arith.cmpf ogt, %40, %41 : vector<16x1xf32>
    %cst_12 = arith.constant 9.99999996E-13 : f32
    %43 = vector.broadcast %cst_12 : f32 to vector<16x1xf32>
    %44 = arith.maximumf %40, %43 : vector<16x1xf32>
    %45 = math.rsqrt %44 : vector<16x1xf32>
    %cst_13 = arith.constant 0.000000e+00 : f32
    %46 = vector.broadcast %cst_13 : f32 to vector<16x1xf32>
    %47 = arith.select %42, %45, %46 : vector<16x1xi1>, vector<16x1xf32>
    %48 = arith.truncf %12 : vector<16x8xf32> to vector<16x8xbf16>
    %c0_14 = arith.constant 0 : index
    %c0_15 = arith.constant 0 : index
    %49 = vector.load %arg3[%c0_14, %c0_15] : memref<8x128xbf16, #tpu.memory_space<vmem>>, vector<8x128xbf16>
    %cst_16 = arith.constant dense<0.000000e+00> : vector<16x128xf32>
    %50 = tpu.matmul %48, %49, %cst_16 {dimension_numbers = #tpu.dot_dimension_numbers<[1], [0], [0], [1], [0, 0, 1, 1], [], []>} : vector<16x8xbf16>, vector<8x128xbf16>, vector<16x128xf32> -> vector<16x128xf32>
    %c0_17 = arith.constant 0 : index
    %c0_18 = arith.constant 0 : index
    %51 = vector.load %arg4[%c0_17, %c0_18] : memref<1x128xf32, #tpu.memory_space<vmem>>, vector<1x128xf32>
    %52 = vector.broadcast %51 : vector<1x128xf32> to vector<16x128xf32>
    %53 = arith.addf %50, %52 : vector<16x128xf32>
    %54 = vector.broadcast %47 : vector<16x1xf32> to vector<16x128xf32>
    %55 = arith.mulf %54, %53 : vector<16x128xf32>
    %56 = arith.truncf %55 : vector<16x128xf32> to vector<16x128xbf16>
    %cst_19 = arith.constant dense<0.000000e+00> : vector<16x128xf32>
    %57 = tpu.matmul %27, %56, %cst_19 {dimension_numbers = #tpu.dot_dimension_numbers<[1], [0], [0], [1], [0, 0, 1, 1], [], []>} : vector<16x16xbf16>, vector<16x128xbf16>, vector<16x128xf32> -> vector<16x128xf32>
    %58 = vector.broadcast %13 : f32 to vector<16x128xf32>
    %59 = arith.mulf %58, %55 : vector<16x128xf32>
    %60 = arith.addf %59, %57 : vector<16x128xf32>
    %61 = vector.broadcast %47 : vector<16x1xf32> to vector<16x128xf32>
    %62 = arith.mulf %61, %60 : vector<16x128xf32>
    %cst_20 = arith.constant 0.000000e+00 : f32
    %63 = vector.broadcast %cst_20 : f32 to vector<16x128xf32>
    %64 = arith.maximumf %62, %63 : vector<16x128xf32>
    %c0_21 = arith.constant 0 : index
    %65 = memref.load %arg5[%c0_21] : memref<4xf32, #tpu.memory_space<smem>>
    %c1_22 = arith.constant 1 : index
    %66 = memref.load %arg5[%c1_22] : memref<4xf32, #tpu.memory_space<smem>>
    %67 = arith.truncf %66 : f32 to bf16
    %68 = vector.broadcast %67 : bf16 to vector<16x16xbf16>
    %69 = arith.mulf %68, %1 : vector<16x16xbf16>
    %c2_23 = arith.constant 2 : index
    %70 = memref.load %arg5[%c2_23] : memref<4xf32, #tpu.memory_space<smem>>
    %71 = arith.truncf %70 : f32 to bf16
    %72 = vector.broadcast %71 : bf16 to vector<16x16xbf16>
    %73 = arith.mulf %72, %7 : vector<16x16xbf16>
    %74 = arith.addf %69, %73 : vector<16x16xbf16>
    %c3_24 = arith.constant 3 : index
    %75 = memref.load %arg5[%c3_24] : memref<4xf32, #tpu.memory_space<smem>>
    %76 = arith.truncf %75 : f32 to bf16
    %77 = vector.broadcast %76 : bf16 to vector<16x16xbf16>
    %78 = arith.mulf %77, %11 : vector<16x16xbf16>
    %79 = arith.addf %74, %78 : vector<16x16xbf16>
    %c1_25 = arith.constant 1 : index
    %80 = memref.load %arg5[%c1_25] : memref<4xf32, #tpu.memory_space<smem>>
    %81 = vector.broadcast %80 : f32 to vector<16x1xf32>
    %82 = arith.mulf %81, %3 : vector<16x1xf32>
    %83 = vector.broadcast %65 : f32 to vector<16x1xf32>
    %84 = arith.addf %83, %82 : vector<16x1xf32>
    %c2_26 = arith.constant 2 : index
    %85 = memref.load %arg5[%c2_26] : memref<4xf32, #tpu.memory_space<smem>>
    %86 = vector.broadcast %85 : f32 to vector<16x1xf32>
    %87 = arith.mulf %86, %6 : vector<16x1xf32>
    %88 = arith.addf %84, %87 : vector<16x1xf32>
    %c3_27 = arith.constant 3 : index
    %89 = memref.load %arg5[%c3_27] : memref<4xf32, #tpu.memory_space<smem>>
    %90 = vector.broadcast %89 : f32 to vector<16x1xf32>
    %91 = arith.mulf %90, %10 : vector<16x1xf32>
    %92 = arith.addf %88, %91 : vector<16x1xf32>
    %cst_28 = arith.constant 0.000000e+00 : f32
    %93 = vector.broadcast %cst_28 : f32 to vector<16x1xf32>
    %94 = arith.cmpf ogt, %92, %93 : vector<16x1xf32>
    %cst_29 = arith.constant 9.99999996E-13 : f32
    %95 = vector.broadcast %cst_29 : f32 to vector<16x1xf32>
    %96 = arith.maximumf %92, %95 : vector<16x1xf32>
    %97 = math.rsqrt %96 : vector<16x1xf32>
    %cst_30 = arith.constant 0.000000e+00 : f32
    %98 = vector.broadcast %cst_30 : f32 to vector<16x1xf32>
    %99 = arith.select %94, %97, %98 : vector<16x1xi1>, vector<16x1xf32>
    %100 = arith.truncf %64 : vector<16x128xf32> to vector<16x128xbf16>
    %c0_31 = arith.constant 0 : index
    %c0_32 = arith.constant 0 : index
    %101 = vector.load %arg6[%c0_31, %c0_32] : memref<128x128xbf16, #tpu.memory_space<vmem>>, vector<128x128xbf16>
    %cst_33 = arith.constant dense<0.000000e+00> : vector<16x128xf32>
    %102 = tpu.matmul %100, %101, %cst_33 {dimension_numbers = #tpu.dot_dimension_numbers<[1], [0], [0], [1], [0, 0, 1, 1], [], []>} : vector<16x128xbf16>, vector<128x128xbf16>, vector<16x128xf32> -> vector<16x128xf32>
    %c0_34 = arith.constant 0 : index
    %c0_35 = arith.constant 0 : index
    %103 = vector.load %arg7[%c0_34, %c0_35] : memref<1x128xf32, #tpu.memory_space<vmem>>, vector<1x128xf32>
    %104 = vector.broadcast %103 : vector<1x128xf32> to vector<16x128xf32>
    %105 = arith.addf %102, %104 : vector<16x128xf32>
    %106 = vector.broadcast %99 : vector<16x1xf32> to vector<16x128xf32>
    %107 = arith.mulf %106, %105 : vector<16x128xf32>
    %108 = arith.truncf %107 : vector<16x128xf32> to vector<16x128xbf16>
    %cst_36 = arith.constant dense<0.000000e+00> : vector<16x128xf32>
    %109 = tpu.matmul %79, %108, %cst_36 {dimension_numbers = #tpu.dot_dimension_numbers<[1], [0], [0], [1], [0, 0, 1, 1], [], []>} : vector<16x16xbf16>, vector<16x128xbf16>, vector<16x128xf32> -> vector<16x128xf32>
    %110 = vector.broadcast %65 : f32 to vector<16x128xf32>
    %111 = arith.mulf %110, %107 : vector<16x128xf32>
    %112 = arith.addf %111, %109 : vector<16x128xf32>
    %113 = vector.broadcast %99 : vector<16x1xf32> to vector<16x128xf32>
    %114 = arith.mulf %113, %112 : vector<16x128xf32>
    %cst_37 = arith.constant 0.000000e+00 : f32
    %115 = vector.broadcast %cst_37 : f32 to vector<16x128xf32>
    %116 = arith.maximumf %114, %115 : vector<16x128xf32>
    %117 = arith.truncf %116 : vector<16x128xf32> to vector<16x128xbf16>
    %c0_38 = arith.constant 0 : index
    %c0_39 = arith.constant 0 : index
    %118 = vector.load %arg8[%c0_38, %c0_39] : memref<128x128xbf16, #tpu.memory_space<vmem>>, vector<128x128xbf16>
    %cst_40 = arith.constant dense<0.000000e+00> : vector<16x128xf32>
    %119 = tpu.matmul %117, %118, %cst_40 {dimension_numbers = #tpu.dot_dimension_numbers<[1], [0], [0], [1], [0, 0, 1, 1], [], []>} : vector<16x128xbf16>, vector<128x128xbf16>, vector<16x128xf32> -> vector<16x128xf32>
    %c0_41 = arith.constant 0 : index
    %c0_42 = arith.constant 0 : index
    %120 = vector.load %arg9[%c0_41, %c0_42] : memref<1x128xf32, #tpu.memory_space<vmem>>, vector<1x128xf32>
    %121 = vector.broadcast %120 : vector<1x128xf32> to vector<16x128xf32>
    %122 = arith.addf %119, %121 : vector<16x128xf32>
    %123 = tpu.iota {dimensions = array<i32: 1>} : vector<16x128xi32>
    %c8_i32 = arith.constant 8 : i32
    %124 = vector.broadcast %c8_i32 : i32 to vector<16x128xi32>
    %125 = arith.cmpi slt, %123, %124 : vector<16x128xi32>
    %cst_43 = arith.constant -1.000000e+30 : f32
    %126 = vector.broadcast %cst_43 : f32 to vector<16x128xf32>
    %127 = arith.select %125, %122, %126 : vector<16x128xi1>, vector<16x128xf32>
    %cst_44 = arith.constant dense<0xFF800000> : vector<16xf32>
    %128 = vector.multi_reduction <maximumf>, %127, %cst_44 [1] : vector<16x128xf32> to vector<16xf32>
    %129 = vector.shape_cast %128 : vector<16xf32> to vector<16x1xf32>
    %130 = vector.broadcast %129 : vector<16x1xf32> to vector<16x128xf32>
    %131 = arith.subf %127, %130 : vector<16x128xf32>
    %132 = math.exp %131 : vector<16x128xf32>
    %cst_45 = arith.constant dense<0.000000e+00> : vector<16xf32>
    %133 = vector.multi_reduction <add>, %132, %cst_45 [1] : vector<16x128xf32> to vector<16xf32>
    %134 = vector.shape_cast %133 : vector<16xf32> to vector<16x1xf32>
    %135 = math.log %134 : vector<16x1xf32>
    %136 = vector.broadcast %135 : vector<16x1xf32> to vector<16x128xf32>
    %137 = arith.subf %131, %136 : vector<16x128xf32>
    %c0_46 = arith.constant 0 : index
    %c0_47 = arith.constant 0 : index
    %138 = vector.load %arg10[%c0_46, %c0_47] : memref<16x128xf32, #tpu.memory_space<vmem>>, vector<16x128xf32>
    tpu.vector_store %arg10[%c0_46, %c0_47], %137 {strides = array<i32>} : memref<16x128xf32, #tpu.memory_space<vmem>>, vector<16x128xf32>,
    return
  }
}

</mosaic_0001>

<bundles_post_ra>
// kernel: pannet_forward.1
= control target key start
LH: loop header
LB: loop body
LE: loop exit
PB: predicated region body
PF: predicated region fallthrough
CT: control target
= control target key end

     0   :  { %s1220_s0 = inlined_call_operand.vmem [shape: f32[16,16], index: 0, kind: input, shape index: {}]   ;;  %s1221_s1 = inlined_call_operand.vmem [shape: f32[16,8], index: 1, kind: input, shape index: {}]   ;;  %s1222_s2 = inlined_call_operand.vmem [shape: f32[4], index: 2, kind: input, shape index: {}]   ;;  %s1223_s3 = inlined_call_operand.vmem [shape: bf16[8,128], index: 3, kind: input, shape index: {}]   ;;  %s1224_s4 = inlined_call_operand.vmem [shape: f32[1,128], index: 4, kind: input, shape index: {}]   ;;  %s1225_s5 = inlined_call_operand.vmem [shape: f32[4], index: 5, kind: input, shape index: {}]   ;;  %s1226_s6 = inlined_call_operand.vmem [shape: bf16[128,128], index: 6, kind: input, shape index: {}]   ;;  %s1227_s7 = inlined_call_operand.vmem [shape: f32[1,128], index: 7, kind: input, shape index: {}]   ;;  %s1228_s8 = inlined_call_operand.vmem [shape: bf16[128,128], index: 8, kind: input, shape index: {}]   ;;  %s1229_s9 = inlined_call_operand.vmem [shape: f32[1,128], index: 9, kind: input, shape index: {}]   ;;  %s1230_s10 = inlined_call_operand.vmem [shape: f32[16,128], index: 10, kind: output, shape index: {}]  }
   0x1   :  { %1233 = sst [smem:[#allocation8_spill]] %s1228_s8 }
   0x2   :  { %1234 = sst [smem:[#allocation9_spill]] %s1229_s9 }
   0x3   :  { %1235 = sst [smem:[#allocation10_spill]] %s1230_s10 }
   0x4   :  { %15 = vsyncpa [#allocation3], 0  ;;  %s27_s15 = sshll.u32 %s1222_s2, 4  ;;  %s28_s15 = int_to_ptr.vmem [resolvable:$true] %s27_s15 }
   0x5   :  { %16 = vsyncpa [#allocation5], 0  ;;  %s41_s18 = sshll.u32 %s1225_s5, 4  ;;  %s916_s19 = scalar_lea.vmem %s28_s15, 16  ;;  %s42_s18 = int_to_ptr.vmem [resolvable:$true] %s41_s18 }
   0x6   :  { %p917_p0 = scmp.ne.s32.totalorder %s28_s15, %s916_s19  ;;  %p921_p1 = scmp.lt.s32.totalorder %s28_s15, %s28_s15 }
   0x7   :  { %p922_p2 = scmp.lt.s32.totalorder %s916_s19, %s916_s19 }
   0x9   :  { %p923_p3 = por %p922_p2, %p921_p1 }
   0xb   :  { %p924_p4 = pnand %p923_p3, %p917_p0 }
   0xd   :  { %927 = shalt.err (!%p924_p4)
}
   0xe   :  { %s944_s20 = smov [#allocation2]   ;;  %s928_s21 = scalar_lea.vmem %s42_s18, 16 }
   0xf   :  { %30 = dma.vmem_to_smem %s28_s15, 16, %s944_s20, [#allocation3]  }
  0x10   :  { %p929_p5 = scmp.ne.s32.totalorder %s42_s18, %s928_s21  ;;  %p933_p6 = scmp.lt.s32.totalorder %s42_s18, %s42_s18 }
  0x11   :  { %p934_p7 = scmp.lt.s32.totalorder %s928_s21, %s928_s21 }
  0x13   :  { %p935_p8 = por %p934_p7, %p933_p6 }
  0x15   :  { %p936_p9 = pnand %p935_p8, %p929_p5 }
  0x17   :  { %939 = shalt.err (!%p936_p9)
}
  0x18   :  { %s945_s2 = smov [#allocation4]  }
  0x19   :  { %44 = dma.vmem_to_smem %s42_s18, 16, %s945_s2, [#allocation5]  }
  0x1a   :  { %940 = dma.done.wait [#allocation3], 16  }
  0x1b   :  { %941 = vsyncadd [#allocation3], 4294967280 }
  0x1c   :  { %942 = dma.done.wait [#allocation5], 16  }
  0x1d   :  { %943 = vsyncadd [#allocation5], 4294967280 }
  0x1e   :  { %59 = sfence }
  0x1f   :  { %v61_v0 = vld [vmem:[%s1220_s0] sm:$0xff]  ;;  %v62_v1 = vld [vmem:[%s1220_s0 + $0x8] sm:$0xff]  ;;  %vm64_vm0 = vcmask 130048   ;;  %v946_v2 = vmov 0.0   ;;  %vm947_vm1 = vmmov 0   ;;  %vm263_vm2 = vcmask 1043456  }
  0x20   :  { %810 = vmatprep.subr.bf16.mxu0 %v946_v2  ;;  %v1016_v3 = vpack.c.bf16 %v62_v1, %v61_v0  ;;  %812 = vmatprep.mubr.msk.bf16.mxu0 %vm947_vm1, %v946_v2  ;;  %v65_v4 = vsel %vm64_vm0, %v61_v0, 0.0  ;;  %v68_v5 = vsel %vm64_vm0, %v62_v1, 0.0  ;;  %v251_v13 = vld [vmem:[%s1223_s3] sm:$0xf]  ;;  %v174_v15 = vld [vmem:[%s1221_s1 + $0x8] sm:$0xff]  ;;  %vm259_vm3 = vcmask 64512  }
  0x21   :  { %66 = vadd.xlane.f32.xlu0 %v65_v4  ;;  %816 = vmatprep.subr.bf16.mxu1 %v946_v2  ;;  %v173_v14 = vld [vmem:[%s1221_s1] sm:$0xff]  ;;  %v265_v16 = vsel %vm263_vm2, %v251_v13, 0  ;;  %s1053_s3 = sld [smem:[#allocation2 + $0x2]]  ;;  %s1058_s11 = sld [smem:[#allocation2 + $0x1]]  ;;  %v885_v46 = vld [vmem:[%s1226_s6 + $0x8] sm:$0xff]   ;;  %v886_v47 = vld [vmem:[%s1226_s6 + $0x10] sm:$0xff]  }
  0x22   :  { %811 = vmatpush3.bf16.msra.mxu0 %v1016_v3  ;;  %817 = vmatpush3.bf16.msra.mxu1 %v1016_v3  ;;  %v250_v17 = vpack.c.bf16 %v174_v15, %v173_v14  ;;  %s1055_s30 = sld [smem:[#allocation4 + $0x2]]  ;;  %s1063_s18 = sld [smem:[#allocation4 + $0x1]]  ;;  %v884_v45 = vld [vmem:[%s1226_s6] sm:$0xff]   ;;  %v887_v48 = vld [vmem:[%s1226_s6 + $0x18] sm:$0xff]  }
  0x23   :  { %818 = vmatprep.mubr.msk.bf16.mxu1 %vm947_vm1, %v946_v2  ;;  %822 = vmatprep.subr.bf16.mxu0 %v946_v2  ;;  %s1073_s23 = sld [smem:[#allocation2 + $0x3]]  ;;  %v888_v49 = vld [vmem:[%s1226_s6 + $0x20] sm:$0xff]  }
  0x24   :  { %828 = vmatprep.subr.bf16.mxu1 %v946_v2  ;;  %s1076_s0 = sld [smem:[#allocation4 + $0x3]] }
  0x25   :  { %813 = vmatmul.mubr.msk.bf16.vlgmr.msra.gmra.mrb[0].mxu0 %vm64_vm0, %v1016_v3  ;;  %69 = vadd.xlane.f32.xlu0 %v68_v5 }
  0x26   :  { %824 = vmatprep.mubr.msk.bf16.mxu0 %vm947_vm1, %v946_v2  ;;  %823 = vmatpush3.bf16.msra.mxu0 %v265_v16 }
  0x27   :  { %834 = vmatprep.subr.bf16.mxu0 %v946_v2  ;;  %s195_s1 = sshrl.u32 %s1053_s3, 16  ;;  %s179_s15 = sshrl.u32 %s1058_s11, 16  ;;  %v226_v51 = vstv %s1058_s11  ;;  %v232_v56 = vstv %s1053_s3 }
  0x28   :  { %s196_s12 = sand.u32 1, %s195_s1  ;;  %s383_s14 = sshrl.u32 %s1055_s30, 16 }
  0x29   :  { %s197_s13 = sadd.s32 32767, %s196_s12  ;;  %s384_s17 = sand.u32 1, %s383_s14  ;;  %v237_v61 = vstv %s1073_s23 }
  0x2a   :  { %s198_s16 = sadd.s32 %s1053_s3, %s197_s13  ;;  %p194_p10 = scmp.ne.f32.partialorder %s1053_s3, %s1053_s3 }
  0x2b   :  { %s180_s19 = sand.u32 1, %s179_s15  ;;  %s199_s20 = sand.u32 4294901760, %s198_s16 }
  0x2c   :  { %s385_s21 = sadd.s32 32767, %s384_s17  ;;  %s181_s2 = sadd.s32 32767, %s180_s19 }
  0x2d   :  { %825 = vmatmul.mubr.msk.bf16.vlgmr.msra.gmra.mrb[4].mxu0 %vm259_vm3, %v250_v17  ;;  %s1240_s20 = smov (%p194_p10, %s199_s20), 2143289344  ;;  %p382_p11 = scmp.ne.f32.partialorder %s1055_s30, %s1055_s30 }
  0x2e   :  { %850 = vmatprep.mubr.msk.bf16.mxu0 %vm947_vm1, %v946_v2  ;;  %s386_s5 = sadd.s32 %s1055_s30, %s385_s21  ;;  %s182_s22 = sadd.s32 %s1058_s11, %s181_s2  ;;  %835 = vmatpush3.bf16.msra.mxu0 %v884_v45 }
  0x2f   :  { %s367_s24 = sshrl.u32 %s1063_s18, 16  ;;  %s387_s25 = sand.u32 4294901760, %s386_s5  ;;  %836 = vmatprep.subr.bf16.mxu0 %v946_v2 }
  0x30   :  { %p178_p12 = scmp.ne.f32.partialorder %s1058_s11, %s1058_s11  ;;  %s183_s26 = sand.u32 4294901760, %s182_s22 }
  0x31   :  { %s368_s27 = sand.u32 1, %s367_s24  ;;  %s1242_s25 = smov (%p382_p11, %s387_s25), 2143289344 }
  0x32   :  { %s1244_s26 = smov (%p178_p12, %s183_s26), 2143289344  ;;  %s369_s28 = sadd.s32 32767, %s368_s27  ;;  %837 = vmatpush3.bf16.msra.mxu0 %v885_v46 }
  0x33   :  { %s212_s29 = sshrl.u32 %s1073_s23, 16  ;;  %s400_s1 = sshrl.u32 %s1076_s0, 16  ;;  %838 = vmatprep.subr.bf16.mxu0 %v946_v2 }
  0x34   :  { %s370_s12 = sadd.s32 %s1063_s18, %s369_s28  ;;  %s213_s13 = sand.u32 1, %s212_s29 }
  0x35   :  { %p366_p13 = scmp.ne.f32.partialorder %s1063_s18, %s1063_s18  ;;  %s401_s14 = sand.u32 1, %s400_s1 }
  0x36   :  { %s371_s15 = sand.u32 4294901760, %s370_s12  ;;  %s214_s16 = sadd.s32 32767, %s213_s13  ;;  %839 = vmatpush3.bf16.msra.mxu0 %v886_v47 }
  0x37   :  { %s402_s17 = sadd.s32 32767, %s401_s14  ;;  %s1246_s15 = smov (%p366_p13, %s371_s15), 2143289344  ;;  %840 = vmatprep.subr.bf16.mxu0 %v946_v2 }
  0x38   :  { %s215_s19 = sadd.s32 %s1073_s23, %s214_s16  ;;  %s403_s21 = sadd.s32 %s1076_s0, %s402_s17 }
  0x39   :  { %s202_s2 = sshrl.u32 %s1240_s20, 16  ;;  %p211_p0 = scmp.ne.f32.partialorder %s1073_s23, %s1073_s23 }
  0x3a   :  { %s216_s5 = sand.u32 4294901760, %s215_s19  ;;  %p399_p1 = scmp.ne.f32.partialorder %s1076_s0, %s1076_s0  ;;  %841 = vmatpush3.bf16.msra.mxu0 %v887_v48 }
  0x3b   :  { %s390_s22 = sshrl.u32 %s1242_s25, 16  ;;  %s404_s24 = sand.u32 4294901760, %s403_s21  ;;  %842 = vmatprep.subr.bf16.mxu0 %v946_v2 }
  0x3c   :  { %s186_s27 = sshrl.u32 %s1244_s26, 16  ;;  %s374_s28 = sshrl.u32 %s1246_s15, 16 }
  0x3d   :  { %s1248_s5 = smov (%p211_p0, %s216_s5), 2143289344  ;;  %s1250_s24 = smov (%p399_p1, %s404_s24), 2143289344 }
  0x3e   :  { %s203_s29 = sshll.u32 %s202_s2, 16  ;;  %s187_s1 = sshll.u32 %s186_s27, 16  ;;  %843 = vmatpush3.bf16.msra.mxu0 %v888_v49 }
  0x3f   :  { %s391_s12 = sshll.u32 %s390_s22, 16  ;;  %s375_s13 = sshll.u32 %s374_s28, 16  ;;  %844 = vmatprep.subr.bf16.mxu0 %v946_v2 }
  0x40   :  { %s219_s14 = sshrl.u32 %s1248_s5, 16  ;;  %s407_s10 = sshrl.u32 %s1250_s24, 16 }
  0x41   :  { %s204_s16 = sor.u32 %s203_s29, %s202_s2  ;;  %s188_s17 = sor.u32 %s187_s1, %s186_s27 }
  0x42   :  { %s392_s20 = sor.u32 %s391_s12, %s390_s22  ;;  %s376_s9 = sor.u32 %s375_s13, %s374_s28  ;;  %v189_v18 = vstv %s188_s17  ;;  %v205_v19 = vstv %s204_s16 }
  0x43   :  { %s220_s8 = sshll.u32 %s219_s14, 16  ;;  %s408_s19 = sshll.u32 %s407_s10, 16  ;;  %v393_v20 = vstv %s392_s20  ;;  %v377_v21 = vstv %s376_s9  ;;  %v191_v23 = vmul.bf16 %v189_v18, %v1016_v3 }
  0x44   :  { %s221_s25 = sor.u32 %s220_s8, %s219_s14  ;;  %s409_s26 = sor.u32 %s408_s19, %s407_s10  ;;  %v379_v28 = vmul.bf16 %v377_v21, %v1016_v3  ;;  %v889_v21 = vld [vmem:[%s1226_s6 + $0x28] sm:$0xff]  }
  0x45   :  { %v222_v30 = vstv %s221_s25  ;;  %v410_v31 = vstv %s409_s26  ;;  %s175_s28 = sld [smem:[#allocation2]]  ;;  %845 = vmatpush3.bf16.msra.mxu0 %v889_v21  ;;  %s1236_s16 = sld [smem:[#allocation8_spill]] }
  0x46   :  { %846 = vmatprep.subr.bf16.mxu0 %v946_v2  ;;  %s363_s14 = sld [smem:[#allocation4]] }
  0x4b   :  { %v229_v55 = vstv %s175_s28  ;;  %s1237_s28 = sld [smem:[#allocation9_spill]] }
  0xae   :  { %v1126_v50 = vpop.xlane.xlu0 %66 }
  0xaf   :  { %v227_v54 = vmul.f32 %v226_v51, %v1126_v50 }
  0xb1   :  { %v230_v59 = vadd.f32 %v229_v55, %v227_v54 }
  0xb2   :  { %v1131_v53 = vpop.xlane.xlu0 %69 }
  0xb3   :  { %v228_v57 = vmul.f32 %v226_v51, %v1131_v53 }
  0xb5   :  { %v231_v62 = vadd.f32 %v229_v55, %v228_v57 }
  0xf8   :  { %v108_v6 = vpop.f32.mrb[0].mxu0 }
  0xf9   :  { %v814_v7 = vpop.f32.mrb[1].mxu0  ;;  %v115_v8 = vsel %vm64_vm0, %v108_v6, 0.0 }
  0xfa   :  { %116 = vadd.xlane.f32.xlu1 %v115_v8  ;;  %v111_v9 = vpop.f32.mrb[2].mxu0 }
  0xfb   :  { %v1034_v10 = vpack.c.bf16 %v111_v9, %v108_v6  ;;  %v815_v11 = vpop.f32.mrb[3].mxu0  ;;  %v118_v12 = vsel %vm64_vm0, %v111_v9, 0.0 }
  0xfc   :  { %v757_v11 = vld [vmem:[%s1224_s4] ss:$0 sm:$0xff]  ;;  %s1238_s4 = sld [smem:[#allocation10_spill]] }
  0xfd   :  { %819 = vmatmul.mubr.msk.bf16.vlgmr.msra.gmra.mrb[0].mxu1 %vm64_vm0, %v1034_v10  ;;  %v207_v24 = vmul.bf16 %v205_v19, %v1034_v10  ;;  %v395_v25 = vmul.bf16 %v393_v20, %v1034_v10 }
  0xfe   :  { %119 = vadd.xlane.f32.xlu1 %v118_v12  ;;  %830 = vmatprep.mubr.msk.bf16.mxu1 %vm947_vm1, %v946_v2 }
  0xff   :  { %v208_v35 = vadd.bf16 %v207_v24, %v191_v23  ;;  %v396_v37 = vadd.bf16 %v395_v25, %v379_v28  ;;  %v891_v23 = vld [vmem:[%s1226_s6 + $0x38] sm:$0xff]  }
 0x100   :  { %v301_v41 = vpop.f32.mrb[4].mxu0 }
 0x101   :  { %v826_v42 = vpop.f32.mrb[5].mxu0  ;;  %v302_v13 = vadd.f32 %v757_v11, %v301_v41  ;;  %v420_v41 = vstv %s1055_s30 }
 0x102   :  { %v304_v43 = vpop.f32.mrb[6].mxu0 }
 0x103   :  { %v827_v44 = vpop.f32.mrb[7].mxu0  ;;  %v305_v16 = vadd.f32 %v757_v11, %v304_v43  ;;  %v425_v43 = vstv %s1076_s0  ;;  %v897_v11 = vld [vmem:[%s1236_s16 + $0x28] sm:$0xff]  }
 0x187   :  { %v1129_v52 = vpop.xlane.xlu1 %116 }
 0x188   :  { %v233_v60 = vmul.f32 %v232_v56, %v1129_v52  ;;  %v421_v45 = vmul.f32 %v420_v41, %v1129_v52 }
 0x18a   :  { %v235_v1 = vadd.f32 %v233_v60, %v230_v59 }
 0x18b   :  { %v1136_v58 = vpop.xlane.xlu1 %119 }
 0x18c   :  { %v234_v63 = vmul.f32 %v232_v56, %v1136_v58  ;;  %v422_v47 = vmul.f32 %v420_v41, %v1136_v58 }
 0x18e   :  { %v236_v5 = vadd.f32 %v234_v63, %v231_v62 }
 0x1d0   :  { %v159_v22 = vpop.f32.mrb[0].mxu1 }
 0x1d1   :  { %v820_v26 = vpop.f32.mrb[1].mxu1  ;;  %v166_v27 = vsel %vm64_vm0, %v159_v22, 0.0 }
 0x1d2   :  { %167 = vadd.xlane.f32.xlu0 %v166_v27  ;;  %v162_v29 = vpop.f32.mrb[2].mxu1 }
 0x1d3   :  { %v172_v32 = vpack.c.bf16 %v162_v29, %v159_v22  ;;  %v821_v33 = vpop.f32.mrb[3].mxu1  ;;  %v169_v34 = vsel %vm64_vm0, %v162_v29, 0.0  ;;  %v890_v22 = vld [vmem:[%s1226_s6 + $0x30] sm:$0xff]  }
 0x1d4   :  { %170 = vadd.xlane.f32.xlu1 %v169_v34  ;;  %847 = vmatpush3.bf16.msra.mxu0 %v890_v22 }
 0x1d5   :  { %v224_v36 = vmul.bf16 %v222_v30, %v172_v32  ;;  %v412_v38 = vmul.bf16 %v410_v31, %v172_v32  ;;  %848 = vmatprep.subr.bf16.mxu0 %v946_v2 }
 0x1d7   :  { %v225_v39 = vadd.bf16 %v224_v36, %v208_v35  ;;  %v1104_v40 = vadd.bf16 %v412_v38, %v396_v37  ;;  %v414_v37 = vstv %s1063_s18 }
 0x1d8   :  { %849 = vmatpush3.bf16.msra.mxu0 %v891_v23  ;;  %v415_v38 = vmul.f32 %v414_v37, %v1126_v50  ;;  %v416_v42 = vmul.f32 %v414_v37, %v1131_v53  ;;  %v763_v53 = vld [vmem:[%s1227_s7] ss:$0 sm:$0xff] }
 0x25f   :  { %v168_v0 = vpop.xlane.xlu0 %167 }
 0x260   :  { %v238_v3 = vmul.f32 %v237_v61, %v168_v0  ;;  %v426_v48 = vmul.f32 %v425_v43, %v168_v0 }
 0x261   :  { %v171_v4 = vpop.xlane.xlu1 %170 }
 0x262   :  { %v240_v6 = vadd.f32 %v238_v3, %v235_v1  ;;  %v239_v7 = vmul.f32 %v237_v61, %v171_v4  ;;  %v427_v49 = vmul.f32 %v425_v43, %v171_v4 }
 0x264   :  { %v244_v8 = vmax.f32 %v240_v6, 1e-12  ;;  %v241_v9 = vadd.f32 %v239_v7, %v236_v5  ;;  %vm242_vm4 = vcmp.gt.f32.partialorder %v240_v6, 0.0  ;;  %v892_v7 = vld [vmem:[%s1236_s16] sm:$0xff]  }
 0x266   :  { %900 = vrsqrt.f32 %v244_v8  ;;  %v245_v10 = vmax.f32 %v241_v9, 1e-12  ;;  %vm243_vm5 = vcmp.gt.f32.partialorder %v241_v9, 0.0  ;;  %v893_v8 = vld [vmem:[%s1236_s16 + $0x8] sm:$0xff]   ;;  %v894_v9 = vld [vmem:[%s1236_s16 + $0x10] sm:$0xff]  }
 0x268   :  { %902 = vrsqrt.f32 %v245_v10  ;;  %v896_v10 = vld [vmem:[%s1236_s16 + $0x20] sm:$0xff]  }
 0x270   :  { %v901_v12 = vpop.eup %900 }
 0x271   :  { %v248_v14 = vsel %vm242_vm4, %v901_v12, 0.0  ;;  %v898_v12 = vld [vmem:[%s1236_s16 + $0x30] sm:$0xff]  }
 0x272   :  { %v903_v15 = vpop.eup %902  ;;  %v308_v18 = vmul.f32 %v302_v13, %v248_v14  ;;  %v899_v13 = vld [vmem:[%s1236_s16 + $0x38] sm:$0xff]  }
 0x273   :  { %v249_v17 = vsel %vm243_vm5, %v903_v15, 0.0 }
 0x274   :  { %v309_v19 = vmul.f32 %v305_v16, %v249_v17  ;;  %v355_v24 = vmul.f32 %v308_v18, %v229_v55 }
 0x276   :  { %v310_v20 = vpack.c.bf16 %v309_v19, %v308_v18  ;;  %v356_v28 = vmul.f32 %v309_v19, %v229_v55 }
 0x278   :  { %829 = vmatpush3.bf16.msra.mxu1 %v310_v20 }
 0x279   :  { %854 = vmatprep.subr.bf16.mxu1 %v946_v2 }
 0x27b   :  { %831 = vmatmul.mubr.msk.bf16.vlgmr.msra.gmra.mrb[4].mxu1 %vm64_vm0, %v225_v39  ;;  %v1161_v39 = vstv %s363_s14 }
 0x27c   :  { %856 = vmatprep.mubr.msk.bf16.mxu1 %vm947_vm1, %v946_v2  ;;  %v418_v44 = vadd.f32 %v1161_v39, %v415_v38  ;;  %v419_v46 = vadd.f32 %v1161_v39, %v416_v42 }
 0x27e   :  { %v423_v51 = vadd.f32 %v421_v45, %v418_v44  ;;  %v424_v54 = vadd.f32 %v422_v47, %v419_v46 }
 0x280   :  { %v428_v55 = vadd.f32 %v426_v48, %v423_v51  ;;  %v429_v50 = vadd.f32 %v427_v49, %v424_v54 }
 0x282   :  { %v432_v56 = vmax.f32 %v428_v55, 1e-12  ;;  %v433_v57 = vmax.f32 %v429_v50, 1e-12  ;;  %vm430_vm6 = vcmp.gt.f32.partialorder %v428_v55, 0.0  ;;  %vm431_vm7 = vcmp.gt.f32.partialorder %v429_v50, 0.0 }
 0x284   :  { %904 = vrsqrt.f32 %v432_v56 }
 0x285   :  { %906 = vrsqrt.f32 %v433_v57 }
 0x28e   :  { %v905_v59 = vpop.eup %904 }
 0x28f   :  { %v907_v60 = vpop.eup %906  ;;  %v436_v1 = vsel %vm430_vm6, %v905_v59, 0.0 }
 0x290   :  { %v437_v3 = vsel %vm431_vm7, %v907_v60, 0.0 }
 0x34e   :  { %v348_v25 = vpop.f32.mrb[4].mxu1 }
 0x34f   :  { %v357_v26 = vadd.f32 %v355_v24, %v348_v25  ;;  %v832_v27 = vpop.f32.mrb[5].mxu1 }
 0x350   :  { %v351_v29 = vpop.f32.mrb[6].mxu1 }
 0x351   :  { %v359_v30 = vmul.f32 %v357_v26, %v248_v14  ;;  %v358_v31 = vadd.f32 %v356_v28, %v351_v29  ;;  %v833_v32 = vpop.f32.mrb[7].mxu1  ;;  %v719_v26 = vlaneseq  ;;  %v773_v28 = vld [vmem:[%s1237_s28] ss:$0 sm:$0xff] }
 0x353   :  { %v360_v33 = vmul.f32 %v358_v31, %v249_v17  ;;  %v361_v34 = vmax.f32 %v359_v30, 0.0  ;;  %v720_v27 = vand.u32 127, %v719_v26 }
 0x355   :  { %v362_v35 = vmax.f32 %v360_v33, 0.0  ;;  %vm721_vm8 = vcmp.lt.s32.totalorder %v720_v27, 8 }
 0x357   :  { %v438_v36 = vpack.c.bf16 %v362_v35, %v361_v34 }
 0x359   :  { %851 = vmatmul.mubr.bf16.vlgmr.msra.gmra.mrb[8].mxu0 %v438_v36 }
 0x42c   :  { %v544_v52 = vpop.f32.mrb[8].mxu0 }
 0x42d   :  { %v545_v61 = vadd.f32 %v763_v53, %v544_v52  ;;  %v852_v62 = vpop.f32.mrb[9].mxu0 }
 0x42e   :  { %v547_v58 = vpop.f32.mrb[10].mxu0 }
 0x42f   :  { %v548_v63 = vadd.f32 %v763_v53, %v547_v58  ;;  %v853_v0 = vpop.f32.mrb[11].mxu0  ;;  %v551_v4 = vmul.f32 %v545_v61, %v436_v1 }
 0x431   :  { %v552_v5 = vmul.f32 %v548_v63, %v437_v3  ;;  %v598_v14 = vmul.f32 %v551_v4, %v1161_v39 }
 0x433   :  { %v553_v6 = vpack.c.bf16 %v552_v5, %v551_v4  ;;  %v599_v18 = vmul.f32 %v552_v5, %v1161_v39 }
 0x435   :  { %855 = vmatpush3.bf16.msra.mxu1 %v553_v6 }
 0x436   :  { %860 = vmatprep.subr.bf16.mxu1 %v946_v2 }
 0x438   :  { %857 = vmatmul.mubr.msk.bf16.vlgmr.msra.gmra.mrb[8].mxu1 %vm64_vm0, %v1104_v40  ;;  %v895_v40 = vld [vmem:[%s1236_s16 + $0x18] sm:$0xff]  }
 0x439   :  { %861 = vmatpush3.bf16.msra.mxu1 %v892_v7  ;;  %876 = vmatprep.mubr.msk.bf16.mxu1 %vm947_vm1, %v946_v2 }
 0x43a   :  { %862 = vmatprep.subr.bf16.mxu1 %v946_v2 }
 0x43d   :  { %863 = vmatpush3.bf16.msra.mxu1 %v893_v8 }
 0x43e   :  { %864 = vmatprep.subr.bf16.mxu1 %v946_v2 }
 0x441   :  { %865 = vmatpush3.bf16.msra.mxu1 %v894_v9 }
 0x442   :  { %866 = vmatprep.subr.bf16.mxu1 %v946_v2 }
 0x445   :  { %867 = vmatpush3.bf16.msra.mxu1 %v895_v40 }
 0x446   :  { %868 = vmatprep.subr.bf16.mxu1 %v946_v2 }
 0x449   :  { %869 = vmatpush3.bf16.msra.mxu1 %v896_v10 }
 0x44a   :  { %870 = vmatprep.subr.bf16.mxu1 %v946_v2 }
 0x44d   :  { %871 = vmatpush3.bf16.msra.mxu1 %v897_v11 }
 0x44e   :  { %872 = vmatprep.subr.bf16.mxu1 %v946_v2 }
 0x451   :  { %873 = vmatpush3.bf16.msra.mxu1 %v898_v12 }
 0x452   :  { %874 = vmatprep.subr.bf16.mxu1 %v946_v2 }
 0x455   :  { %875 = vmatpush3.bf16.msra.mxu1 %v899_v13 }
 0x50b   :  { %v591_v15 = vpop.f32.mrb[8].mxu1 }
 0x50c   :  { %v600_v16 = vadd.f32 %v598_v14, %v591_v15  ;;  %v858_v17 = vpop.f32.mrb[9].mxu1 }
 0x50d   :  { %v594_v19 = vpop.f32.mrb[10].mxu1 }
 0x50e   :  { %v602_v20 = vmul.f32 %v600_v16, %v436_v1  ;;  %v601_v21 = vadd.f32 %v599_v18, %v594_v19  ;;  %v859_v22 = vpop.f32.mrb[11].mxu1 }
 0x510   :  { %v603_v23 = vmul.f32 %v601_v21, %v437_v3  ;;  %v604_v24 = vmax.f32 %v602_v20, 0.0 }
 0x512   :  { %v605_v25 = vmax.f32 %v603_v23, 0.0 }
 0x514   :  { %v606_v2 = vpack.c.bf16 %v605_v25, %v604_v24 }
 0x516   :  { %877 = vmatmul.mubr.bf16.vlgmr.msra.gmra.mrb[12].mxu1 %v606_v2 }
 0x5e9   :  { %v712_v29 = vpop.f32.mrb[12].mxu1 }
 0x5ea   :  { %v713_v30 = vadd.f32 %v773_v28, %v712_v29  ;;  %v878_v31 = vpop.f32.mrb[13].mxu1 }
 0x5eb   :  { %v715_v32 = vpop.f32.mrb[14].mxu1 }
 0x5ec   :  { %v716_v33 = vadd.f32 %v773_v28, %v715_v32  ;;  %v879_v34 = vpop.f32.mrb[15].mxu1  ;;  %v722_v35 = vsel %vm721_vm8, %v713_v30, -1e+30 }
 0x5ed   :  { %724 = vmax.xlane.f32.xlu0 %v722_v35 }
 0x5ee   :  { %v723_v36 = vsel %vm721_vm8, %v716_v33, -1e+30 }
 0x5ef   :  { %726 = vmax.xlane.f32.xlu1 %v723_v36 }
 0x67a   :  { %v725_v37 = vpop.xlane.xlu0 %724 }
 0x67b   :  { %v728_v38 = vsub.f32 %v722_v35, %v725_v37 }
 0x67c   :  { %v727_v39 = vpop.xlane.xlu1 %726 }
 0x67d   :  { %v730_v41 = vmul.f32 1.442695, %v728_v38  ;;  %v729_v42 = vsub.f32 %v723_v36, %v727_v39 }
 0x67f   :  { %908 = vpow2.f32 %v730_v41  ;;  %v732_v43 = vmul.f32 1.442695, %v729_v42 }
 0x681   :  { %910 = vpow2.f32 %v732_v43 }
 0x689   :  { %v909_v44 = vpop.eup %908 }
 0x68a   :  { %734 = vadd.xlane.f32.xlu0 %v909_v44 }
 0x68b   :  { %v911_v45 = vpop.eup %910 }
 0x68c   :  { %736 = vadd.xlane.f32.xlu1 %v911_v45 }
 0x717   :  { %v735_v46 = vpop.xlane.xlu0 %734 }
 0x718   :  { %912 = vlog2.f32 %v735_v46 }
 0x719   :  { %v737_v47 = vpop.xlane.xlu1 %736 }
 0x71a   :  { %914 = vlog2.f32 %v737_v47 }
 0x722   :  { %v913_v48 = vpop.eup %912 }
 0x723   :  { %v739_v49 = vmul.f32 0.6931472, %v913_v48 }
 0x724   :  { %v915_v51 = vpop.eup %914 }
 0x725   :  { %v742_v54 = vsub.f32 %v728_v38, %v739_v49  ;;  %v741_v55 = vmul.f32 0.6931472, %v915_v51 }
 0x727   :  { %744 = vst [vmem:[%s1238_s4] sm:$0xff] %v742_v54  ;;  %v743_v50 = vsub.f32 %v729_v42, %v741_v55 }
 0x729   :  { %745 = vst [vmem:[%s1238_s4 + $0x8] sm:$0xff] %v743_v50 }
 0x72a   :  { %750 = vsyncpa [#allocation3], 1 }
 0x72b   :  { %751 = vsyncpa [#allocation5], 1 }

</bundles_post_ra>
